<compile_context>
chip_gen: v6e
topology: v6e:2x2x1
jax: 0.10.0
libtpu: 0.0.40
codegen_flags: <defaults>
</compile_context>

<pallas_src>
import functools

import numpy as np

import jax
import jax.numpy as jnp
from jax import lax
from jax.experimental import pallas as pl
from jax.experimental.pallas import tpu as pltpu


# ---------------------------------------------------------------------------
# Generation-aware VMEM budget & tile helpers
# ---------------------------------------------------------------------------
def _vmem_budget_bytes():
    """Scoped-VMEM budget: 3/4 of physical VMEM, capped at 96 MiB.
    v5e/v6e (128 MiB) -> 96 MiB, v7x (64 MiB/TC) -> 48 MiB."""
    cap = None
    try:
        info = pltpu.get_tpu_info()
        cap = getattr(info, "vmem_capacity_bytes", None)
    except Exception:
        cap = None
    if not cap:
        cap = 64 * 1024 * 1024  # conservative fallback (v7x per-TC VMEM)
    return int(min(cap * 3 // 4, 96 * 1024 * 1024))


def _pick_tile(dim, target):
    """Largest lane/MXU-friendly tile (multiple of 128) <= target that divides
    dim; falls back to the full dimension (always a legal block)."""
    if dim <= target:
        return dim
    for t in range(target, 127, -128):
        if dim % t == 0:
            return t
    # TODO(synk): pad inputs to a 128 multiple instead of full-dim fallback.
    return dim


def _compute_dtype(dtype, use_bf16_mxu):
    """MXU feed dtype: bf16 for f32 models when requested (accumulators stay f32)."""
    if use_bf16_mxu and dtype == jnp.float32:
        return jnp.bfloat16
    return dtype


# ---------------------------------------------------------------------------
# Kernel 1: tiled linear  y = x @ W^T + b   (PyTorch weight layout (out, in))
# Preferred form: full-K (no reduction grid axis, no accumulator RMW).
# ---------------------------------------------------------------------------
def _linear_kernel_fullk(x_ref, w_ref, b_ref, o_ref, *, mxu_dtype):
    x = x_ref[...].astype(mxu_dtype)          # (tm, K)
    w = w_ref[...].astype(mxu_dtype)          # (tn, K)
    y = lax.dot_general(x, w, dimension_numbers=(((1,), (1,)), ((), ())),
                        preferred_element_type=jnp.float32)
    o_ref[...] = (y + b_ref[...].astype(jnp.float32)).astype(o_ref.dtype)


def _linear_kernel_ktiled(x_ref, w_ref, b_ref, o_ref, acc_ref, *, mxu_dtype):
    k = pl.program_id(2)

    @pl.when(k == 0)
    def _():
        acc_ref[...] = jnp.zeros(acc_ref.shape, jnp.float32)

    acc_ref[...] += lax.dot_general(
        x_ref[...].astype(mxu_dtype), w_ref[...].astype(mxu_dtype),
        dimension_numbers=(((1,), (1,)), ((), ())),
        preferred_element_type=jnp.float32)

    @pl.when(k == pl.num_programs(2) - 1)
    def _():
        o_ref[...] = (acc_ref[...] + b_ref[...].astype(jnp.float32)
                      ).astype(o_ref.dtype)


def _linear_vmem_bytes(tm, tn, tk, isz, k_tiled):
    blocks = 2 * (tm * tk + tn * tk + tm * tn) * isz + 2 * tn * isz
    scratch = tm * tn * 4 if k_tiled else 0
    temps = 2 * tm * tn * 4
    return blocks + scratch + temps


def _select_linear_tiles(M, K, Nout, isz, budget):
    # Prefer full-K: whole reduction in one grid step per (i, j).
    for t in (512, 384, 256, 128):
        tm, tn = _pick_tile(M, t), _pick_tile(Nout, t)
        if _linear_vmem_bytes(tm, tn, K, isz, False) <= budget:
            return tm, tn, K, False
    # Fall back to tiled-K with f32 VMEM accumulator.
    for tmn, tk_t in ((512, 512), (256, 512), (256, 256), (128, 256), (128, 128)):
        tm, tn, tk = _pick_tile(M, tmn), _pick_tile(Nout, tmn), _pick_tile(K, tk_t)
        if _linear_vmem_bytes(tm, tn, tk, isz, True) <= budget:
            return tm, tn, tk, True
    return _pick_tile(M, 128), _pick_tile(Nout, 128), _pick_tile(K, 128), True


def linear(x, w, b, *, mxu_dtype=None, vmem_budget=None):
    """x: (M, K), w: (Nout, K), b: (Nout,) -> (M, Nout)."""
    M, K = x.shape
    Nout = w.shape[0]
    isz = x.dtype.itemsize
    if mxu_dtype is None:
        mxu_dtype = x.dtype
    if vmem_budget is None:
        vmem_budget = _vmem_budget_bytes()
    tm, tn, tk, k_tiled = _select_linear_tiles(M, K, Nout, isz, vmem_budget)
    b2 = b.reshape(1, Nout)
    cost = pl.CostEstimate(
        flops=2 * M * K * Nout, transcendentals=0,
        bytes_accessed=int((M * K + Nout * K + M * Nout + Nout) * isz))

    if not k_tiled:
        return pl.pallas_call(
            functools.partial(_linear_kernel_fullk, mxu_dtype=mxu_dtype),
            out_shape=jax.ShapeDtypeStruct((M, Nout), x.dtype),
            grid_spec=pltpu.PrefetchScalarGridSpec(
                num_scalar_prefetch=0,
                grid=(M // tm, Nout // tn),
                in_specs=[
                    pl.BlockSpec((tm, K), lambda i, j: (i, 0)),
                    pl.BlockSpec((tn, K), lambda i, j: (j, 0)),
                    pl.BlockSpec((1, tn), lambda i, j: (0, j)),
                ],
                out_specs=pl.BlockSpec((tm, tn), lambda i, j: (i, j)),
            ),
            compiler_params=pltpu.CompilerParams(
                dimension_semantics=("parallel", "parallel"),
                vmem_limit_bytes=vmem_budget),
            cost_estimate=cost,
        )(x, w, b2)

    return pl.pallas_call(
        functools.partial(_linear_kernel_ktiled, mxu_dtype=mxu_dtype),
        out_shape=jax.ShapeDtypeStruct((M, Nout), x.dtype),
        grid_spec=pltpu.PrefetchScalarGridSpec(
            num_scalar_prefetch=0,
            grid=(M // tm, Nout // tn, K // tk),
            in_specs=[
                pl.BlockSpec((tm, tk), lambda i, j, k: (i, k)),
                pl.BlockSpec((tn, tk), lambda i, j, k: (j, k)),
                pl.BlockSpec((1, tn), lambda i, j, k: (0, j)),
            ],
            out_specs=pl.BlockSpec((tm, tn), lambda i, j, k: (i, j)),
            scratch_shapes=[pltpu.VMEM((tm, tn), jnp.float32)],
        ),
        compiler_params=pltpu.CompilerParams(
            dimension_semantics=("parallel", "parallel", "arbitrary"),
            vmem_limit_bytes=vmem_budget),
        cost_estimate=cost,
    )(x, w, b2)


# ---------------------------------------------------------------------------
# Kernel 2: flash-attention style SDPA with online softmax
#   q: (BH, L, D), k/v: (BH, S, D) -> out: (BH, L, D)
#   grid = (BH, L//tq, S//tkv), KV reduction axis last ("arbitrary").
# ---------------------------------------------------------------------------
def _flash_sdpa_kernel(q_ref, k_ref, v_ref, o_ref, m_ref, l_ref, acc_ref,
                       qs_ref, *, scale, mxu_dtype, approx_recip):
    kv = pl.program_id(2)

    @pl.when(kv == 0)
    def _():
        m_ref[...] = jnp.full(m_ref.shape, -jnp.inf, jnp.float32)
        l_ref[...] = jnp.zeros(l_ref.shape, jnp.float32)
        acc_ref[...] = jnp.zeros(acc_ref.shape, jnp.float32)
        # Fold the softmax scale into q ONCE per q-tile (removes a full
        # (tq, tkv) f32 VPU multiply from every kv step).
        qs_ref[...] = (q_ref[0].astype(jnp.float32) * scale).astype(mxu_dtype)

    k = k_ref[0].astype(mxu_dtype)      # (tkv, D)
    v = v_ref[0].astype(mxu_dtype)      # (tkv, D)

    # scores in f32; contract last dims (no transpose copy)
    s = lax.dot_general(qs_ref[...], k,
                        dimension_numbers=(((1,), (1,)), ((), ())),
                        preferred_element_type=jnp.float32)     # (tq, tkv)

    m_prev = m_ref[...]                                          # (tq, 1)
    m_new = jnp.maximum(m_prev, jnp.max(s, axis=-1, keepdims=True))
    alpha = jnp.exp(m_prev - m_new)                              # (tq, 1)
    p = jnp.exp(s - m_new)                                       # (tq, tkv) f32

    l_ref[...] = alpha * l_ref[...] + jnp.sum(p, axis=-1, keepdims=True)
    acc_ref[...] = alpha * acc_ref[...] + jnp.dot(
        p.astype(mxu_dtype), v, preferred_element_type=jnp.float32)
    m_ref[...] = m_new

    @pl.when(kv == pl.num_programs(2) - 1)
    def _():
        if approx_recip:
            inv_l = pl.reciprocal(l_ref[...], approx=True)       # EUP slot
            o_ref[0] = (acc_ref[...] * inv_l).astype(o_ref.dtype)
        else:
            o_ref[0] = (acc_ref[...] / l_ref[...]).astype(o_ref.dtype)


def _flash_vmem_bytes(tq, tkv, D, isz, mxu_isz):
    blocks = 2 * (2 * tq * D + 2 * tkv * D) * isz          # q, out, k, v
    scratch = tq * D * 4 + tq * D * mxu_isz + 4 * tq * 4   # acc, qs, m, l
    temps = 3 * tq * tkv * 4                                # s, p + headroom
    return blocks + scratch + temps


def flash_sdpa(q, k, v, scale, *, mxu_dtype=None, vmem_budget=None,
               approx_recip=True):
    BH, L, D = q.shape
    S = k.shape[1]
    isz = q.dtype.itemsize
    if mxu_dtype is None:
        mxu_dtype = q.dtype
    if vmem_budget is None:
        vmem_budget = _vmem_budget_bytes()
    mxu_isz = np.dtype(mxu_dtype).itemsize

    tq = tkv = None
    for tq_t, tkv_t in ((512, 1024), (512, 512), (256, 512),
                        (256, 256), (128, 256), (128, 128)):
        tq_c, tkv_c = _pick_tile(L, tq_t), _pick_tile(S, tkv_t)
        if _flash_vmem_bytes(tq_c, tkv_c, D, isz, mxu_isz) <= vmem_budget:
            tq, tkv = tq_c, tkv_c
            break
    if tq is None:
        tq, tkv = _pick_tile(L, 128), _pick_tile(S, 128)

    cost = pl.CostEstimate(
        flops=int(4 * BH * L * S * D),
        transcendentals=int(BH * L * (S + 1)),
        bytes_accessed=int((2 * BH * L * D + 2 * BH * S * D) * isz))

    kern = functools.partial(_flash_sdpa_kernel, scale=scale,
                             mxu_dtype=mxu_dtype, approx_recip=approx_recip)
    return pl.pallas_call(
        kern,
        out_shape=jax.ShapeDtypeStruct((BH, L, D), q.dtype),
        grid_spec=pltpu.PrefetchScalarGridSpec(
            num_scalar_prefetch=0,
            grid=(BH, L // tq, S // tkv),
            in_specs=[
                pl.BlockSpec((1, tq, D), lambda b, qi, ki: (b, qi, 0)),
                pl.BlockSpec((1, tkv, D), lambda b, qi, ki: (b, ki, 0)),
                pl.BlockSpec((1, tkv, D), lambda b, qi, ki: (b, ki, 0)),
            ],
            out_specs=pl.BlockSpec((1, tq, D), lambda b, qi, ki: (b, qi, 0)),
            scratch_shapes=[
                pltpu.VMEM((tq, 1), jnp.float32),    # running max m
                pltpu.VMEM((tq, 1), jnp.float32),    # running denom l
                pltpu.VMEM((tq, D), jnp.float32),    # output accumulator
                pltpu.VMEM((tq, D), mxu_dtype),      # pre-scaled q
            ],
        ),
        compiler_params=pltpu.CompilerParams(
            dimension_semantics=("parallel", "parallel", "arbitrary"),
            vmem_limit_bytes=vmem_budget),
        cost_estimate=cost,
    )(q, k, v)


# ---------------------------------------------------------------------------
# Kernel 3: fused out-projection (head merge fused into the GEMM)
#   attn: (N*H, L, D), w: (H, E, D) view of W_out, bias (1, E) -> (N, L, E)
#   out[n, l, :] = sum_h attn[n*H+h, l, :] @ w[h].T + b
# ---------------------------------------------------------------------------
def _out_proj_kernel(attn_ref, w_ref, b_ref, o_ref, acc_ref, *, mxu_dtype):
    h = pl.program_id(3)

    @pl.when(h == 0)
    def _():
        acc_ref[...] = jnp.zeros(acc_ref.shape, jnp.float32)

    acc_ref[...] += lax.dot_general(
        attn_ref[0].astype(mxu_dtype), w_ref[0].astype(mxu_dtype),
        dimension_numbers=(((1,), (1,)), ((), ())),
        preferred_element_type=jnp.float32)

    @pl.when(h == pl.num_programs(3) - 1)
    def _():
        o_ref[0] = (acc_ref[...] + b_ref[...].astype(jnp.float32)
                    ).astype(o_ref.dtype)


def _outproj_vmem_bytes(tl, te, D, isz):
    blocks = 2 * (tl * D + te * D + tl * te) * isz + 2 * te * isz
    scratch = tl * te * 4
    temps = 2 * tl * te * 4
    return blocks + scratch + temps


def out_projection(attn, w_out, b_out, batch, num_heads, *, mxu_dtype=None,
                   vmem_budget=None):
    NH, L, D = attn.shape
    E = w_out.shape[0]
    H, N = num_heads, batch
    isz = attn.dtype.itemsize
    if mxu_dtype is None:
        mxu_dtype = attn.dtype
    if vmem_budget is None:
        vmem_budget = _vmem_budget_bytes()

    # Per-head weight view: w_r[h, e, d] == w_out[e, h*D + d]  (tiny, one-time)
    w_r = w_out.reshape(E, H, D).transpose(1, 0, 2)
    b2 = b_out.reshape(1, E)

    tl = te = None
    for t in (512, 384, 256, 128):
        tl_c, te_c = _pick_tile(L, t), _pick_tile(E, t)
        if _outproj_vmem_bytes(tl_c, te_c, D, isz) <= vmem_budget:
            tl, te = tl_c, te_c
            break
    if tl is None:
        tl, te = _pick_tile(L, 128), _pick_tile(E, 128)

    cost = pl.CostEstimate(
        flops=int(2 * N * L * E * E), transcendentals=0,
        bytes_accessed=int((NH * L * D + E * E + E + N * L * E) * isz))

    return pl.pallas_call(
        functools.partial(_out_proj_kernel, mxu_dtype=mxu_dtype),
        out_shape=jax.ShapeDtypeStruct((N, L, E), attn.dtype),
        grid_spec=pltpu.PrefetchScalarGridSpec(
            num_scalar_prefetch=0,
            grid=(N, L // tl, E // te, H),
            in_specs=[
                pl.BlockSpec((1, tl, D), lambda n, i, j, h: (n * H + h, i, 0)),
                pl.BlockSpec((1, te, D), lambda n, i, j, h: (h, j, 0)),
                pl.BlockSpec((1, te), lambda n, i, j, h: (0, j)),
            ],
            out_specs=pl.BlockSpec((1, tl, te), lambda n, i, j, h: (n, i, j)),
            scratch_shapes=[pltpu.VMEM((tl, te), jnp.float32)],
        ),
        compiler_params=pltpu.CompilerParams(
            dimension_semantics=("parallel", "parallel", "parallel", "arbitrary"),
            vmem_limit_bytes=vmem_budget),
        cost_estimate=cost,
    )(attn, w_r, b2)


# ---------------------------------------------------------------------------
# MultiHeadAttention forward
# ---------------------------------------------------------------------------
def multi_head_attention(query, key, value, params, num_heads, *,
                         use_bf16_mxu=True):
    L, N, E = query.shape
    S = key.shape[0]
    D = E // num_heads
    scale = 1.0 / float(D) ** 0.5
    budget = _vmem_budget_bytes()
    mxu_dtype = _compute_dtype(query.dtype, use_bf16_mxu)

    w_in = params["in_proj_weight"]      # (3E, E)
    b_in = params["in_proj_bias"]        # (3E,)
    w_out = params["out_proj_weight"]    # (E, E)
    b_out = params["out_proj_bias"]      # (E,)

    # NOTE: fusion gates use Python object identity; under jit with distinct
    # tracers the unfused path runs (numerically identical, more calls).
    if (query is key) and (key is value):
        # Self-attention: single fused QKV in-projection.
        qkv = linear(query.reshape(L * N, E), w_in, b_in,
                     mxu_dtype=mxu_dtype, vmem_budget=budget)    # (L*N, 3E)
        q, k, v = qkv[:, :E], qkv[:, E:2 * E], qkv[:, 2 * E:]
    elif key is value:
        # Shared-KV cross-attention: fuse K and V in-projections.
        q = linear(query.reshape(L * N, E), w_in[:E], b_in[:E],
                   mxu_dtype=mxu_dtype, vmem_budget=budget)
        kv = linear(key.reshape(S * N, E), w_in[E:], b_in[E:],
                    mxu_dtype=mxu_dtype, vmem_budget=budget)     # (S*N, 2E)
        k, v = kv[:, :E], kv[:, E:]
    else:
        q = linear(query.reshape(L * N, E), w_in[:E], b_in[:E],
                   mxu_dtype=mxu_dtype, vmem_budget=budget)
        k = linear(key.reshape(S * N, E), w_in[E:2 * E], b_in[E:2 * E],
                   mxu_dtype=mxu_dtype, vmem_budget=budget)
        v = linear(value.reshape(S * N, E), w_in[2 * E:], b_in[2 * E:],
                   mxu_dtype=mxu_dtype, vmem_budget=budget)

    # split heads: (L*N, E) -> (N*H, L, D)   (b = n*H + h)
    q = q.reshape(L, N * num_heads, D).transpose(1, 0, 2)
    k = k.reshape(S, N * num_heads, D).transpose(1, 0, 2)
    v = v.reshape(S, N * num_heads, D).transpose(1, 0, 2)

    attn = flash_sdpa(q, k, v, scale, mxu_dtype=mxu_dtype,
                      vmem_budget=budget)                        # (N*H, L, D)

    # Fused out-projection consumes (N*H, L, D) directly (head reduction in
    # kernel); only one cheap (N, L, E) -> (L, N, E) transpose remains.
    out = out_projection(attn, w_out, b_out, N, num_heads,
                         mxu_dtype=mxu_dtype, vmem_budget=budget)  # (N, L, E)
    return out.transpose(1, 0, 2)                                  # (L, N, E)


# ---------------------------------------------------------------------------
# Pure-JAX reference
# ---------------------------------------------------------------------------
def reference_mha(query, key, value, params, num_heads):
    L, N, E = query.shape
    S = key.shape[0]
    D = E // num_heads
    scale = 1.0 / float(D) ** 0.5
    w_in, b_in = params["in_proj_weight"], params["in_proj_bias"]
    wq, wk, wv = w_in[:E], w_in[E:2 * E], w_in[2 * E:]
    bq, bk, bv = b_in[:E], b_in[E:2 * E], b_in[2 * E:]
    q = query @ wq.T + bq
    k = key @ wk.T + bk
    v = value @ wv.T + bv
    q = q.reshape(L, N * num_heads, D).transpose(1, 0, 2)
    k = k.reshape(S, N * num_heads, D).transpose(1, 0, 2)
    v = v.reshape(S, N * num_heads, D).transpose(1, 0, 2)
    s = jnp.einsum("bld,bsd->bls", q, k) * scale
    p = jax.nn.softmax(s, axis=-1)
    o = jnp.einsum("bls,bsd->bld", p, v)
    o = o.transpose(1, 0, 2).reshape(L * N, E)
    o = o @ params["out_proj_weight"].T + params["out_proj_bias"]
    return o.reshape(L, N, E)


if __name__ == "__main__":
    # small shapes consistent with nn.MultiheadAttention(embed_dim, num_heads)
    L, N, E, H = 8, 2, 32, 4

    key0 = jax.random.PRNGKey(0)
    k1, k2, k3, k4, k5, k6, k7 = jax.random.split(key0, 7)

    params = {
        "in_proj_weight": jax.random.normal(k1, (3 * E, E), jnp.float32) * 0.1,
        "in_proj_bias": jax.random.normal(k2, (3 * E,), jnp.float32) * 0.1,
        "out_proj_weight": jax.random.normal(k3, (E, E), jnp.float32) * 0.1,
        "out_proj_bias": jax.random.normal(k4, (E,), jnp.float32) * 0.1,
    }

    query = jax.random.normal(k5, (L, N, E), jnp.float32)
    key_ = jax.random.normal(k6, (L, N, E), jnp.float32)
    value = jax.random.normal(k7, (L, N, E), jnp.float32)

    # Path 1: cross-attention, distinct q/k/v, exact f32 MXU path.
    out = multi_head_attention(query, key_, value, params, H, use_bf16_mxu=False)
    out = jax.block_until_ready(out)
    ref = reference_mha(query, key_, value, params, H)
    assert out.shape == (L, N, E)
    assert jnp.allclose(out, ref, atol=2e-3, rtol=2e-3), "mismatch (cross-attn f32)"

    # Path 2: shared-KV cross-attention (fused K/V in-projection), f32 MXU path.
    out_kv = multi_head_attention(query, key_, key_, params, H, use_bf16_mxu=False)
    out_kv = jax.block_until_ready(out_kv)
    ref_kv = reference_mha(query, key_, key_, params, H)
    assert jnp.allclose(out_kv, ref_kv, atol=2e-3, rtol=2e-3), "mismatch (shared-kv f32)"

    # Path 3: self-attention (fused QKV in-projection), f32 MXU path.
    out_sa = multi_head_attention(query, query, query, params, H, use_bf16_mxu=False)
    out_sa = jax.block_until_ready(out_sa)
    ref_sa = reference_mha(query, query, query, params, H)
    assert jnp.allclose(out_sa, ref_sa, atol=2e-3, rtol=2e-3), "mismatch (self-attn f32)"

    # Path 4: self-attention with bf16 MXU feed (f32 accumulators/stats) —
    # deliberate precision tradeoff per perf review, looser tolerance.
    out_bf = multi_head_attention(query, query, query, params, H, use_bf16_mxu=True)
    out_bf = jax.block_until_ready(out_bf)
    assert jnp.allclose(out_bf, ref_sa, atol=3e-2, rtol=3e-2), "mismatch (self-attn bf16)"

    print("KERNEL_OK")
</pallas_src>

<mosaic_0001>
module attributes {stable_mosaic.version = 11 : i64} {
  func.func @_linear_kernel_fullk(%arg0: i32, %arg1: i32, %arg2: memref<16x32xf32, #tpu.memory_space<vmem>>, %arg3: memref<32x32xf32, #tpu.memory_space<vmem>>, %arg4: memref<1x32xf32, #tpu.memory_space<vmem>>, %arg5: memref<16x32xf32, #tpu.memory_space<vmem>>) attributes {dimension_semantics = [#tpu.dimension_semantics<parallel>, #tpu.dimension_semantics<parallel>], iteration_bounds = array<i64: 1, 1>, scalar_prefetch = 0 : i64, scratch_operands = 0 : i64, tpu.core_type = #tpu.core_type<tc>, window_params = [{transform_indices = @transform_0, window_bounds = array<i64: 16, 32>}, {transform_indices = @transform_1, window_bounds = array<i64: 32, 32>}, {transform_indices = @transform_2, window_bounds = array<i64: 1, 32>}, {transform_indices = @transform_3, window_bounds = array<i64: 16, 32>}]} {
    %c0 = arith.constant 0 : index
    %c0_0 = arith.constant 0 : index
    %0 = vector.load %arg2[%c0, %c0_0] : memref<16x32xf32, #tpu.memory_space<vmem>>, vector<16x32xf32>
    %c0_1 = arith.constant 0 : index
    %c0_2 = arith.constant 0 : index
    %1 = vector.load %arg3[%c0_1, %c0_2] : memref<32x32xf32, #tpu.memory_space<vmem>>, vector<32x32xf32>
    %cst = arith.constant dense<0.000000e+00> : vector<16x32xf32>
    %2 = tpu.matmul %0, %1, %cst {dimension_numbers = #tpu.dot_dimension_numbers<[1], [1], [0], [0], [0, 0, 1, 0], [], []>} : vector<16x32xf32>, vector<32x32xf32>, vector<16x32xf32> -> vector<16x32xf32>
    %c0_3 = arith.constant 0 : index
    %c0_4 = arith.constant 0 : index
    %3 = vector.load %arg4[%c0_3, %c0_4] : memref<1x32xf32, #tpu.memory_space<vmem>>, vector<1x32xf32>
    %4 = vector.broadcast %3 : vector<1x32xf32> to vector<16x32xf32>
    %5 = arith.addf %2, %4 : vector<16x32xf32>
    %c0_5 = arith.constant 0 : index
    %c0_6 = arith.constant 0 : index
    %6 = vector.load %arg5[%c0_5, %c0_6] : memref<16x32xf32, #tpu.memory_space<vmem>>, vector<16x32xf32>
    tpu.vector_store %arg5[%c0_5, %c0_6], %5 {strides = array<i32>} : memref<16x32xf32, #tpu.memory_space<vmem>>, vector<16x32xf32>,
    return
  }
  func.func @transform_0(%arg0: i32, %arg1: i32) -> (i32, i32) {
    %c0_i32 = arith.constant 0 : i32
    %c0_i32_0 = arith.constant 0 : i32
    return %arg0, %c0_i32 : i32, i32
  }
  func.func @transform_1(%arg0: i32, %arg1: i32) -> (i32, i32) {
    %c0_i32 = arith.constant 0 : i32
    %c0_i32_0 = arith.constant 0 : i32
    return %arg1, %c0_i32 : i32, i32
  }
  func.func @transform_2(%arg0: i32, %arg1: i32) -> (i32, i32) {
    %c0_i32 = arith.constant 0 : i32
    %c0_i32_0 = arith.constant 0 : i32
    return %c0_i32, %arg1 : i32, i32
  }
  func.func @transform_3(%arg0: i32, %arg1: i32) -> (i32, i32) {
    %c0_i32 = arith.constant 0 : i32
    return %arg0, %arg1 : i32, i32
  }
}

</mosaic_0001>

<bundles_post_ra>
// kernel: tpu_custom_call.1
= control target key start
LH: loop header
LB: loop body
LE: loop exit
PB: predicated region body
PF: predicated region fallthrough
CT: control target
= control target key end

     0   :  { %8 = vsyncpa [#allocation3], 0  ;;  %s323_s0 = inlined_call_operand.hbm [shape: f32[16,32], index: 0, kind: input, shape index: {}]   ;;  %s324_s1 = inlined_call_operand.hbm [shape: f32[32,32], index: 1, kind: input, shape index: {}]   ;;  %s325_s2 = inlined_call_operand.vmem [shape: f32[1,32], index: 2, kind: input, shape index: {}]   ;;  %s326_s3 = inlined_call_operand.hbm [shape: f32[16,32], index: 3, kind: output, shape index: {}]  }
   0x1   :  { %9 = vsyncpa [#allocation6], 0 }
   0x2   :  { %10 = vsyncpa [#allocation4], 0  ;;  %s265_s12 = smov [#allocation2]  }
   0x3   :  { %s16_s13 = sshll.u32 %s265_s12, 4  ;;  %s17_s13 = int_to_ptr.vmem [resolvable:$true] %s16_s13 }
   0x4   :  { %s207_s14 = scalar_lea.vmem %s17_s13, 256  ;;  %p212_p1 = scmp.lt.s32.totalorder %s17_s13, %s17_s13 }
   0x5   :  { %p208_p0 = scmp.ne.s32.totalorder %s17_s13, %s207_s14  ;;  %p213_p2 = scmp.lt.s32.totalorder %s207_s14, %s207_s14 }
   0x7   :  { %p214_p3 = por %p213_p2, %p212_p1 }
   0x9   :  { %p215_p4 = pnand %p214_p3, %p208_p0 }
   0xb   :  { %218 = shalt.err (!%p215_p4)
}
   0xc   :  { %s266_s15 = smov 128   ;;  %s267_s16 = smov 8  }
   0xd   :  { %22 = dma.hbm_to_vmem [thread:$0]  %s323_s0, 256, %s17_s13, [#allocation3], %s266_s15, %s266_s15, %s267_s16  }
   0xe   :  { %s268_s19 = smov [#allocation5]  }
   0xf   :  { %s28_s20 = sshll.u32 %s268_s19, 4  ;;  %s29_s20 = int_to_ptr.vmem [resolvable:$true] %s28_s20 }
  0x10   :  { %s227_s21 = scalar_lea.vmem %s29_s20, 512  ;;  %p232_p6 = scmp.lt.s32.totalorder %s29_s20, %s29_s20 }
  0x11   :  { %p228_p5 = scmp.ne.s32.totalorder %s29_s20, %s227_s21  ;;  %p233_p7 = scmp.lt.s32.totalorder %s227_s21, %s227_s21 }
  0x13   :  { %p234_p8 = por %p233_p7, %p232_p6 }
  0x15   :  { %p235_p9 = pnand %p234_p8, %p228_p5 }
  0x17   :  { %238 = shalt.err (!%p235_p9)
}
  0x18   :  { %34 = dma.hbm_to_vmem [thread:$0]  %s324_s1, 512, %s29_s20, [#allocation6], %s266_s15, %s266_s15, %s267_s16  }
  0x19   :  { %259 = dma.done.wait [#allocation3], 256  }
  0x1a   :  { %260 = vsyncadd [#allocation3], 4294967040 }
  0x1b   :  { %261 = dma.done.wait [#allocation6], 512  }
  0x1c   :  { %262 = vsyncadd [#allocation6], 4294966784  ;;  %vm56_vm0 = vcmask 261120   ;;  %v48_v0 = vld [vmem:[#allocation5 + $0x18] sm:$0xff]  ;;  %v47_v1 = vld [vmem:[#allocation5 + $0x10] sm:$0xff]  ;;  %s269_s24 = smov [#allocation7]  }
  0x1d   :  { %183 = vmatprep.subr.msk.mxu0 %vm56_vm0, %v48_v0  ;;  %v43_v2 = vld [vmem:[#allocation2] sm:$0xff]  ;;  %v46_v3 = vld [vmem:[#allocation5 + $0x8] sm:$0xff]  ;;  %v45_v4 = vld [vmem:[#allocation5] sm:$0xff]  ;;  %s157_s25 = sshll.u32 %s269_s24, 4  ;;  %s158_s25 = int_to_ptr.vmem [resolvable:$true] %s157_s25 }
  0x1e   :  { %184 = vmatpush3.xpose.msk.msra.mxu0 %vm56_vm0, %v48_v0  ;;  %191 = vmatprep.mubr.msk.f32.mxu0 %vm56_vm0, %v43_v2  ;;  %v44_v5 = vld [vmem:[#allocation2 + $0x8] sm:$0xff]  ;;  %v170_v6 = vld [vmem:[%s325_s2] ss:$0 sm:$0xff]  ;;  %s239_s26 = scalar_lea.vmem %s158_s25, 256  ;;  %p244_p11 = scmp.lt.s32.totalorder %s158_s25, %s158_s25 }
  0x1f   :  { %185 = vmatprep.subr.msk.mxu0 %vm56_vm0, %v47_v1  ;;  %p240_p10 = scmp.ne.s32.totalorder %s158_s25, %s239_s26  ;;  %p245_p12 = scmp.lt.s32.totalorder %s239_s26, %s239_s26 }
  0x21   :  { %p246_p13 = por %p245_p12, %p244_p11 }
  0x22   :  { %186 = vmatpush3.xpose.msk.msra.mxu0 %vm56_vm0, %v47_v1 }
  0x23   :  { %187 = vmatprep.subr.msk.mxu0 %vm56_vm0, %v46_v3  ;;  %p247_p0 = pnand %p246_p13, %p240_p10 }
  0x26   :  { %188 = vmatpush3.xpose.msk.msra.mxu0 %vm56_vm0, %v46_v3 }
  0x27   :  { %189 = vmatprep.subr.msk.mxu0 %vm56_vm0, %v45_v4 }
  0x2a   :  { %190 = vmatpush3.xpose.msk.msra.mxu0 %vm56_vm0, %v45_v4 }
  0x2d   :  { %192 = vmatmul.mubr.msk.f32.vlgmr.msra.gmra.mxu0 %vm56_vm0, %v44_v5 }
  0xed   :  { %v193_v7 = vpop.f32.mrf.mxu0 }
  0xee   :  { %v147_v8 = vadd.f32 %v193_v7, %v170_v6 }
  0xef   :  { %v141_v9 = vpop.f32.mrf.mxu0 }
  0xf0   :  { %151 = vst.msk [vmem:[#allocation7 + $0x8] sm:$0xff] %vm56_vm0, %v147_v8  ;;  %v142_v10 = vadd.f32 %v170_v6, %v141_v9 }
  0xf2   :  { %150 = vst.msk [vmem:[#allocation7] sm:$0xff] %vm56_vm0, %v142_v10 }
  0xf3   :  { %250 = shalt.err (!%p247_p0)
}
  0xf4   :  { %163 = dma.vmem_to_hbm [thread:$0]  %s158_s25, 256, %s326_s3, [#allocation4], %s266_s15, %s266_s15, %s267_s16  }
  0xf5   :  { %263 = dma.done.wait [#allocation4], 256  }
  0xf6   :  { %264 = vsyncadd [#allocation4], 4294967040 }
  0xf7   :  { %167 = vsyncpa [#allocation3], 1 }
  0xf8   :  { %168 = vsyncpa [#allocation6], 1 }
  0xf9   :  { %169 = vsyncpa [#allocation4], 1 }

</bundles_post_ra>
